<compile_context>
chip_gen: v6e
topology: v6e:2x2x1
jax: 0.10.0
libtpu: 0.0.40
codegen_flags: <defaults>
</compile_context>

<pallas_src>
import math

import jax
import jax.numpy as jnp
import numpy as np
from jax import lax
from jax.experimental import pallas as pl
from jax.experimental.pallas import tpu as pltpu

_EPS = 1e-5


# ---------------------------------------------------------------------------
# Wrapper-side weight lowering (pure layout work, built once per call).
# ---------------------------------------------------------------------------
def _conv_bands(w_hwio, w_in, w_out, stride, dtype):
    """Banded weights (3, Win*Cin, Wout*Cout) for a 3x3 conv, padding=1.

    band[ky][wi*Cin+ci, wo*Cout+co] = W[ky, kx, ci, co] iff wi == wo*s + kx - 1
    (out-of-range taps are dropped -> implicit zero padding along W).
    """
    cin, cout = w_hwio.shape[2], w_hwio.shape[3]
    wi = jnp.arange(w_in)[:, None, None]
    wo = jnp.arange(w_out)[None, :, None]
    kx = jnp.arange(3)[None, None, :]
    sel = (wi == wo * stride + kx - 1).astype(jnp.float32)      # (Win, Wout, 3)
    bands = jnp.einsum('wok,ykcd->ywcod', sel, w_hwio)          # (3,Win,Cin,Wout,Cout)
    return bands.reshape(3, w_in * cin, w_out * cout).astype(dtype)


def _proj_band(w_io, w_in, w_out, stride, dtype):
    """Banded weights (Win*Cin, Wout*Cout) for the 1x1 stride-s projection."""
    cin, cout = w_io.shape
    sel = (jnp.arange(w_in)[:, None] == jnp.arange(w_out)[None, :] * stride)
    band = jnp.einsum('wo,cd->wcod', sel.astype(jnp.float32), w_io)
    return band.reshape(w_in * cin, w_out * cout).astype(dtype)


def _fold_bn(gamma, beta, mean, var, w_out):
    """Fold eval-mode BN into per-lane scale/bias tiled over the W positions."""
    scale = gamma / jnp.sqrt(var + _EPS)
    bias = beta - mean * scale
    return (jnp.tile(scale, w_out).reshape(1, -1).astype(jnp.float32),
            jnp.tile(bias, w_out).reshape(1, -1).astype(jnp.float32))


def _pick_bt(batch, h_out, target_m=256):
    """Largest batch tile Bt (a divisor of batch) with Bt*Ho <= target_m,
    preferring >=2 grid steps (v7x has 2 TensorCores per chip)."""
    cands = [bt for bt in range(1, batch + 1)
             if batch % bt == 0 and bt * h_out <= target_m] or [1]
    two_step = [bt for bt in cands if batch // bt >= 2]
    return max(two_step) if two_step else max(cands)


# ---------------------------------------------------------------------------
# Kernel
# ---------------------------------------------------------------------------
def _make_kernel(stride, has_proj, fuse_proj, Bt, Ho, n_lanes, cdt):
    M = Bt * Ho

    def kernel(*refs):
        ph_refs = refs[:stride]                          # row-phase slabs
        b1a_ref, b1m_ref, b2_ref, sb_ref = refs[stride:stride + 4]
        idx = stride + 4
        if has_proj and not fuse_proj:
            bsc_ref = refs[idx]
            idx += 1
        out_ref, hpad_ref = refs[idx], refs[idx + 1]

        def rows(start):
            # (Bt*Ho, K) matmul LHS: for every image in the batch block, the Ho
            # padded-H rows start, start+stride, ...  `start` is a Python int,
            # so this is a static contiguous ref slice (no full slab kept live).
            p, base = start % stride, start // stride
            blk = ph_refs[p][:, base:base + Ho, :]       # (Bt, Ho, K) load
            return blk.reshape(M, blk.shape[-1])

        # Packed per-lane BN scale/bias (f32, broadcast over the M axis).
        s1, t1 = sb_ref[0:1, :], sb_ref[1:2, :]
        s2, t2 = sb_ref[2:3, :], sb_ref[3:4, :]

        # ---- conv1 (3x3, stride) as 3 banded MXU matmuls + folded BN1 + ReLU.
        #      The 1x1 projection shortcut shares the ky==1 LHS and is fused
        #      into that matmul along N when the split is 128-lane aligned.
        acc = jnp.dot(rows(0), b1a_ref[0], preferred_element_type=jnp.float32)
        acc += jnp.dot(rows(2), b1a_ref[1], preferred_element_type=jnp.float32)
        x_mid = rows(1)
        mid = jnp.dot(x_mid, b1m_ref[...], preferred_element_type=jnp.float32)
        if fuse_proj:
            acc += mid[:, :n_lanes]
            sc = mid[:, n_lanes:] * sb_ref[4:5, :] + sb_ref[5:6, :]
        else:
            acc += mid
            if has_proj:
                sc = jnp.dot(x_mid, bsc_ref[...],
                             preferred_element_type=jnp.float32)
                sc = sc * sb_ref[4:5, :] + sb_ref[5:6, :]
            else:
                sc = x_mid.astype(jnp.float32)
        h = jnp.maximum(acc * s1 + t1, 0.0)

        # ---- H-pad the intermediate in the compute dtype (the W padding
        #      already lives inside the band matrices).  Halo rows re-zeroed
        #      every step so a core-sharded "parallel" batch grid stays correct.
        zrow = jnp.zeros((Bt, 1, n_lanes), cdt)
        hpad_ref[:, 0:1, :] = zrow                       # top halo row
        hpad_ref[:, Ho + 1:Ho + 2, :] = zrow             # bottom halo row
        hpad_ref[:, 1:1 + Ho, :] = h.reshape(Bt, Ho, n_lanes).astype(cdt)

        # ---- conv2 (3x3, stride 1) as 3 banded MXU matmuls + folded BN2 ----
        acc2 = jnp.zeros((M, n_lanes), jnp.float32)
        for ky in range(3):
            lhs = hpad_ref[:, ky:ky + Ho, :].reshape(M, n_lanes)
            acc2 += jnp.dot(lhs, b2_ref[ky], preferred_element_type=jnp.float32)
        out = acc2 * s2 + t2

        # ---- residual add + final ReLU (f32), lane-dense store ----
        y = jnp.maximum(out + sc, 0.0)
        out_ref[...] = y.reshape(Bt, Ho, n_lanes).astype(out_ref.dtype)

    return kernel


# ---------------------------------------------------------------------------
# Forward wrapper
# ---------------------------------------------------------------------------
def basic_block_forward(x_nchw, params, stride=1, use_bf16=True):
    """Pallas forward. x_nchw: (B, Cin, H, W) f32 -> (B, Cout, Ho, Wo) f32."""
    B, Cin, H, W = x_nchw.shape
    Cout = params["w1"].shape[0]
    has_proj = (stride != 1) or (Cin != Cout)
    Ho = (H + 2 - 3) // stride + 1
    Wo = (W + 2 - 3) // stride + 1
    n_lanes = Wo * Cout
    cdt = jnp.bfloat16 if use_bf16 else jnp.float32
    # Fuse the 1x1 projection into conv1's ky==1 matmul along N only when the
    # result split stays 128-lane aligned (otherwise the split costs a relayout).
    fuse_proj = has_proj and (n_lanes % 128 == 0)

    # Batch-block the grid so each MXU push sees M = Bt*Ho rows.  Keep Bt = 1
    # when Ho is not sublane-tile aligned (avoids in-kernel relayout reshapes).
    row_align = 16 if use_bf16 else 8
    Bt = _pick_bt(B, Ho) if Ho % row_align == 0 else 1
    n_blocks = B // Bt

    # Lane-density packing: when the residual goes through the 1x1 projection
    # (so the raw input never feeds the residual directly), zero-pad Cin so the
    # slab lane width W*Cin is a multiple of 128 (dense input DMA, dense conv1 K).
    Cin_p = Cin
    if has_proj and (W * Cin) % 128 != 0:
        step = 128 // math.gcd(W, 128)
        cand = ((Cin + step - 1) // step) * step
        if cand <= max(8, 2 * Cin):
            Cin_p = cand

    w1 = params["w1"]
    wsc = params.get("wsc")
    if Cin_p != Cin:
        pad_c = Cin_p - Cin
        x_nchw = jnp.pad(x_nchw, ((0, 0), (0, pad_c), (0, 0), (0, 0)))
        w1 = jnp.pad(w1, ((0, 0), (0, pad_c), (0, 0), (0, 0)))
        wsc = jnp.pad(wsc, ((0, 0), (0, pad_c), (0, 0), (0, 0)))

    # NCHW -> per-row slab (B, H+2, W*Cin_p): pad H only, fuse (W, C) on lanes.
    x = jnp.transpose(x_nchw, (0, 2, 3, 1)).astype(jnp.float32)
    x = jnp.pad(x, ((0, 0), (1, 1), (0, 0), (0, 0)))
    x = x.reshape(B, H + 2, W * Cin_p).astype(cdt)
    # Space-to-depth phase split of the padded rows (stride==1 -> just x).
    phases = [x[:, p::stride, :] for p in range(stride)]

    w1_hwio = jnp.transpose(w1, (2, 3, 1, 0)).astype(jnp.float32)          # HWIO
    w2_hwio = jnp.transpose(params["w2"], (2, 3, 1, 0)).astype(jnp.float32)
    b1 = _conv_bands(w1_hwio, W, Wo, stride, cdt)       # (3, W*Cin_p, n_lanes)
    b2 = _conv_bands(w2_hwio, Wo, Wo, 1, cdt)           # (3, n_lanes,  n_lanes)
    s1, t1 = _fold_bn(params["g1"], params["be1"], params["m1"], params["v1"], Wo)
    s2, t2 = _fold_bn(params["g2"], params["be2"], params["m2"], params["v2"], Wo)

    b1a = jnp.stack([b1[0], b1[2]])                     # ky = 0, 2 bands
    sb_rows = [s1, t1, s2, t2]
    bsc = None
    if has_proj:
        wsc_io = wsc[:, :, 0, 0].T.astype(jnp.float32)              # (Cin_p, Cout)
        bsc = _proj_band(wsc_io, W, Wo, stride, cdt)                # (W*Cin_p, n_lanes)
        ssc, tsc = _fold_bn(params["gsc"], params["besc"],
                            params["msc"], params["vsc"], Wo)
        sb_rows += [ssc, tsc]
    if fuse_proj:
        b1m = jnp.concatenate([b1[1], bsc], axis=1)     # (W*Cin_p, 2*n_lanes)
    else:
        b1m = b1[1]                                     # (W*Cin_p, n_lanes)
    sb = jnp.concatenate(sb_rows, axis=0)               # (4 or 6, n_lanes) f32

    inputs = list(phases) + [b1a, b1m, b2, sb]
    in_specs = [pl.BlockSpec((Bt,) + tuple(p.shape[1:]), lambda b: (b, 0, 0))
                for p in phases]
    in_specs += [
        pl.BlockSpec(b1a.shape, lambda b: (0, 0, 0)),
        pl.BlockSpec(b1m.shape, lambda b: (0, 0)),
        pl.BlockSpec(b2.shape, lambda b: (0, 0, 0)),
        pl.BlockSpec(sb.shape, lambda b: (0, 0)),
    ]
    if has_proj and not fuse_proj:
        inputs.append(bsc)
        in_specs.append(pl.BlockSpec(bsc.shape, lambda b: (0, 0)))

    kernel = _make_kernel(stride, has_proj, fuse_proj, Bt, Ho, n_lanes, cdt)
    y = pl.pallas_call(
        kernel,
        out_shape=jax.ShapeDtypeStruct((B, Ho, n_lanes), jnp.float32),
        grid_spec=pltpu.PrefetchScalarGridSpec(
            num_scalar_prefetch=0,
            grid=(n_blocks,),
            in_specs=in_specs,
            out_specs=pl.BlockSpec((Bt, Ho, n_lanes), lambda b: (b, 0, 0)),
            scratch_shapes=[pltpu.VMEM((Bt, Ho + 2, n_lanes), cdt)],
        ),
        compiler_params=pltpu.CompilerParams(
            dimension_semantics=("parallel",)),
    )(*inputs)
    return jnp.transpose(y.reshape(B, Ho, Wo, Cout), (0, 3, 1, 2))       # NCHW


# ---------------------------------------------------------------------------
# Plain-JAX reference (PyTorch eval-mode BasicBlock semantics).  When use_bf16,
# conv inputs/weights are quantized to bf16 with f32 accumulation, matching the
# kernel's MXU precision; with use_bf16=False it is exact f32.
# ---------------------------------------------------------------------------
def basic_block_reference(x_nchw, params, stride=1, use_bf16=True):
    Cin = x_nchw.shape[1]
    Cout = params["w1"].shape[0]
    has_proj = (stride != 1) or (Cin != Cout)
    cdt = jnp.bfloat16 if use_bf16 else jnp.float32
    q = lambda a: a.astype(cdt).astype(jnp.float32)

    x = q(jnp.transpose(x_nchw, (0, 2, 3, 1)).astype(jnp.float32))

    def conv(xx, w_oihw, s, pad):
        w = q(jnp.transpose(w_oihw, (2, 3, 1, 0)).astype(jnp.float32))
        return lax.conv_general_dilated(
            xx, w, (s, s), pad, dimension_numbers=("NHWC", "HWIO", "NHWC"),
            precision=lax.Precision.HIGHEST)

    def bn(xx, g, be, m, v):
        return (xx - m) / jnp.sqrt(v + _EPS) * g + be

    h = jnp.maximum(bn(conv(x, params["w1"], stride, ((1, 1), (1, 1))),
                       params["g1"], params["be1"], params["m1"], params["v1"]),
                    0.0)
    out = bn(conv(q(h), params["w2"], 1, ((1, 1), (1, 1))),
             params["g2"], params["be2"], params["m2"], params["v2"])
    if has_proj:
        sc = bn(conv(x, params["wsc"], stride, ((0, 0), (0, 0))),
                params["gsc"], params["besc"], params["msc"], params["vsc"])
    else:
        sc = x
    return jnp.transpose(jnp.maximum(out + sc, 0.0), (0, 3, 1, 2))


def make_params(key, Cin, Cout):
    ks = jax.random.split(key, 16)
    return {
        "w1": jax.random.normal(ks[0], (Cout, Cin, 3, 3), jnp.float32) * 0.1,
        "g1": 1.0 + 0.1 * jax.random.normal(ks[1], (Cout,), jnp.float32),
        "be1": 0.1 * jax.random.normal(ks[2], (Cout,), jnp.float32),
        "m1": 0.1 * jax.random.normal(ks[3], (Cout,), jnp.float32),
        "v1": jax.random.uniform(ks[4], (Cout,), jnp.float32, 0.5, 1.5),
        "w2": jax.random.normal(ks[5], (Cout, Cout, 3, 3), jnp.float32) * 0.1,
        "g2": 1.0 + 0.1 * jax.random.normal(ks[6], (Cout,), jnp.float32),
        "be2": 0.1 * jax.random.normal(ks[7], (Cout,), jnp.float32),
        "m2": 0.1 * jax.random.normal(ks[8], (Cout,), jnp.float32),
        "v2": jax.random.uniform(ks[9], (Cout,), jnp.float32, 0.5, 1.5),
        # projection shortcut (used when stride != 1 or Cin != Cout)
        "wsc": jax.random.normal(ks[10], (Cout, Cin, 1, 1), jnp.float32) * 0.1,
        "gsc": 1.0 + 0.1 * jax.random.normal(ks[11], (Cout,), jnp.float32),
        "besc": 0.1 * jax.random.normal(ks[12], (Cout,), jnp.float32),
        "msc": 0.1 * jax.random.normal(ks[13], (Cout,), jnp.float32),
        "vsc": jax.random.uniform(ks[14], (Cout,), jnp.float32, 0.5, 1.5),
    }


if __name__ == "__main__":
    key = jax.random.PRNGKey(0)
    # (B, Cin, Cout, H, W, stride, use_bf16, tol)
    configs = [
        (2, 4, 8, 16, 16, 1, True, 2e-3),    # projection shortcut, fused into conv1 N
        (2, 4, 8, 16, 16, 1, False, 2e-4),   # same block, pure f32 (eval-mode exact)
        (2, 8, 8, 16, 16, 1, True, 2e-3),    # identity shortcut
        (2, 4, 8, 16, 16, 2, True, 2e-3),    # stride-2 block + projection shortcut
        (8, 4, 8, 16, 16, 1, True, 2e-3),    # batch-blocked (Bt=4) + fused projection
        (16, 8, 8, 16, 16, 1, True, 2e-3),   # batch-blocked (Bt=8, M=128), identity
    ]
    for (B, Cin, Cout, H, W, stride, use_bf16, tol) in configs:
        key, kx, kp = jax.random.split(key, 3)
        x = jax.random.normal(kx, (B, Cin, H, W), jnp.float32)
        params = make_params(kp, Cin, Cout)

        y = jax.block_until_ready(
            basic_block_forward(x, params, stride=stride, use_bf16=use_bf16))
        y_ref = jax.block_until_ready(
            basic_block_reference(x, params, stride=stride, use_bf16=use_bf16))

        Ho = (H + 2 - 3) // stride + 1
        Wo = (W + 2 - 3) // stride + 1
        assert y.shape == (B, Cout, Ho, Wo), y.shape
        err = float(np.max(np.abs(np.asarray(y) - np.asarray(y_ref))))
        assert err < tol, "cfg %s: max abs err %g" % (
            str((B, Cin, Cout, stride, use_bf16)), err)

    print("KERNEL_OK")
</pallas_src>

<mosaic_0001>
module attributes {stable_mosaic.version = 11 : i64} {
  func.func @kernel(%arg0: i32, %arg1: memref<1x18x128xbf16, #tpu.memory_space<vmem>>, %arg2: memref<2x128x128xbf16, #tpu.memory_space<vmem>>, %arg3: memref<128x256xbf16, #tpu.memory_space<vmem>>, %arg4: memref<3x128x128xbf16, #tpu.memory_space<vmem>>, %arg5: memref<6x128xf32, #tpu.memory_space<vmem>>, %arg6: memref<1x16x128xf32, #tpu.memory_space<vmem>>, %arg7: memref<1x18x128xbf16, #tpu.memory_space<vmem>>) attributes {dimension_semantics = [#tpu.dimension_semantics<parallel>], iteration_bounds = array<i64: 2>, scalar_prefetch = 0 : i64, scratch_operands = 1 : i64, tpu.core_type = #tpu.core_type<tc>, window_params = [{transform_indices = @transform_0, window_bounds = array<i64: 1, 18, 128>}, {pipeline_mode = #tpu.pipeline_mode<synchronous>, transform_indices = @transform_1, window_bounds = array<i64: 2, 128, 128>}, {pipeline_mode = #tpu.pipeline_mode<synchronous>, transform_indices = @transform_2, window_bounds = array<i64: 128, 256>}, {pipeline_mode = #tpu.pipeline_mode<synchronous>, transform_indices = @transform_3, window_bounds = array<i64: 3, 128, 128>}, {pipeline_mode = #tpu.pipeline_mode<synchronous>, transform_indices = @transform_4, window_bounds = array<i64: 6, 128>}, {transform_indices = @transform_5, window_bounds = array<i64: 1, 16, 128>}]} {
    %c0 = arith.constant 0 : index
    %c0_0 = arith.constant 0 : index
    %0 = vector.load %arg5[%c0, %c0_0] : memref<6x128xf32, #tpu.memory_space<vmem>>, vector<1x128xf32>
    %c1 = arith.constant 1 : index
    %c0_1 = arith.constant 0 : index
    %1 = vector.load %arg5[%c1, %c0_1] : memref<6x128xf32, #tpu.memory_space<vmem>>, vector<1x128xf32>
    %c2 = arith.constant 2 : index
    %c0_2 = arith.constant 0 : index
    %2 = vector.load %arg5[%c2, %c0_2] : memref<6x128xf32, #tpu.memory_space<vmem>>, vector<1x128xf32>
    %c3 = arith.constant 3 : index
    %c0_3 = arith.constant 0 : index
    %3 = vector.load %arg5[%c3, %c0_3] : memref<6x128xf32, #tpu.memory_space<vmem>>, vector<1x128xf32>
    %c0_4 = arith.constant 0 : index
    %c0_5 = arith.constant 0 : index
    %c0_6 = arith.constant 0 : index
    %4 = vector.load %arg1[%c0_4, %c0_5, %c0_6] : memref<1x18x128xbf16, #tpu.memory_space<vmem>>, vector<1x16x128xbf16>
    %5 = vector.shape_cast %4 : vector<1x16x128xbf16> to vector<16x128xbf16>
    %c0_7 = arith.constant 0 : index
    %c0_8 = arith.constant 0 : index
    %c0_9 = arith.constant 0 : index
    %6 = vector.load %arg2[%c0_7, %c0_8, %c0_9] : memref<2x128x128xbf16, #tpu.memory_space<vmem>>, vector<1x128x128xbf16>
    %7 = vector.shape_cast %6 : vector<1x128x128xbf16> to vector<128x128xbf16>
    %cst = arith.constant dense<0.000000e+00> : vector<16x128xf32>
    %8 = tpu.matmul %5, %7, %cst {dimension_numbers = #tpu.dot_dimension_numbers<[1], [0], [0], [1], [0, 0, 1, 1], [], []>} : vector<16x128xbf16>, vector<128x128xbf16>, vector<16x128xf32> -> vector<16x128xf32>
    %c0_10 = arith.constant 0 : index
    %c2_11 = arith.constant 2 : index
    %c0_12 = arith.constant 0 : index
    %9 = vector.load %arg1[%c0_10, %c2_11, %c0_12] : memref<1x18x128xbf16, #tpu.memory_space<vmem>>, vector<1x16x128xbf16>
    %10 = vector.shape_cast %9 : vector<1x16x128xbf16> to vector<16x128xbf16>
    %c1_13 = arith.constant 1 : index
    %c0_14 = arith.constant 0 : index
    %c0_15 = arith.constant 0 : index
    %11 = vector.load %arg2[%c1_13, %c0_14, %c0_15] : memref<2x128x128xbf16, #tpu.memory_space<vmem>>, vector<1x128x128xbf16>
    %12 = vector.shape_cast %11 : vector<1x128x128xbf16> to vector<128x128xbf16>
    %cst_16 = arith.constant dense<0.000000e+00> : vector<16x128xf32>
    %13 = tpu.matmul %10, %12, %cst_16 {dimension_numbers = #tpu.dot_dimension_numbers<[1], [0], [0], [1], [0, 0, 1, 1], [], []>} : vector<16x128xbf16>, vector<128x128xbf16>, vector<16x128xf32> -> vector<16x128xf32>
    %14 = arith.addf %8, %13 : vector<16x128xf32>
    %c0_17 = arith.constant 0 : index
    %c1_18 = arith.constant 1 : index
    %c0_19 = arith.constant 0 : index
    %15 = vector.load %arg1[%c0_17, %c1_18, %c0_19] : memref<1x18x128xbf16, #tpu.memory_space<vmem>>, vector<1x16x128xbf16>
    %16 = vector.shape_cast %15 : vector<1x16x128xbf16> to vector<16x128xbf16>
    %c0_20 = arith.constant 0 : index
    %c0_21 = arith.constant 0 : index
    %17 = vector.load %arg3[%c0_20, %c0_21] : memref<128x256xbf16, #tpu.memory_space<vmem>>, vector<128x256xbf16>
    %cst_22 = arith.constant dense<0.000000e+00> : vector<16x256xf32>
    %18 = tpu.matmul %16, %17, %cst_22 {dimension_numbers = #tpu.dot_dimension_numbers<[1], [0], [0], [1], [0, 0, 1, 1], [], []>} : vector<16x128xbf16>, vector<128x256xbf16>, vector<16x256xf32> -> vector<16x256xf32>
    %19 = vector.extract_strided_slice %18 {offsets = [0, 0], sizes = [16, 128], strides = [1, 1]} : vector<16x256xf32> to vector<16x128xf32>
    %20 = arith.addf %14, %19 : vector<16x128xf32>
    %21 = vector.extract_strided_slice %18 {offsets = [0, 128], sizes = [16, 128], strides = [1, 1]} : vector<16x256xf32> to vector<16x128xf32>
    %c4 = arith.constant 4 : index
    %c0_23 = arith.constant 0 : index
    %22 = vector.load %arg5[%c4, %c0_23] : memref<6x128xf32, #tpu.memory_space<vmem>>, vector<1x128xf32>
    %23 = vector.broadcast %22 : vector<1x128xf32> to vector<16x128xf32>
    %24 = arith.mulf %21, %23 : vector<16x128xf32>
    %c5 = arith.constant 5 : index
    %c0_24 = arith.constant 0 : index
    %25 = vector.load %arg5[%c5, %c0_24] : memref<6x128xf32, #tpu.memory_space<vmem>>, vector<1x128xf32>
    %26 = vector.broadcast %25 : vector<1x128xf32> to vector<16x128xf32>
    %27 = arith.addf %24, %26 : vector<16x128xf32>
    %28 = vector.broadcast %0 : vector<1x128xf32> to vector<16x128xf32>
    %29 = arith.mulf %20, %28 : vector<16x128xf32>
    %30 = vector.broadcast %1 : vector<1x128xf32> to vector<16x128xf32>
    %31 = arith.addf %29, %30 : vector<16x128xf32>
    %cst_25 = arith.constant 0.000000e+00 : f32
    %32 = vector.broadcast %cst_25 : f32 to vector<16x128xf32>
    %33 = arith.maximumf %31, %32 : vector<16x128xf32>
    %cst_26 = arith.constant 0.000000e+00 : bf16
    %34 = vector.broadcast %cst_26 : bf16 to vector<1x1x128xbf16>
    %c0_27 = arith.constant 0 : index
    %c0_28 = arith.constant 0 : index
    %c0_29 = arith.constant 0 : index
    %35 = vector.load %arg7[%c0_27, %c0_28, %c0_29] : memref<1x18x128xbf16, #tpu.memory_space<vmem>>, vector<1x1x128xbf16>
    tpu.vector_store %arg7[%c0_27, %c0_28, %c0_29], %34 {strides = array<i32>} : memref<1x18x128xbf16, #tpu.memory_space<vmem>>, vector<1x1x128xbf16>,
    %c0_30 = arith.constant 0 : index
    %c17 = arith.constant 17 : index
    %c0_31 = arith.constant 0 : index
    %36 = vector.load %arg7[%c0_30, %c17, %c0_31] : memref<1x18x128xbf16, #tpu.memory_space<vmem>>, vector<1x1x128xbf16>
    tpu.vector_store %arg7[%c0_30, %c17, %c0_31], %34 {strides = array<i32>} : memref<1x18x128xbf16, #tpu.memory_space<vmem>>, vector<1x1x128xbf16>,
    %37 = vector.shape_cast %33 : vector<16x128xf32> to vector<1x16x128xf32>
    %38 = arith.truncf %37 : vector<1x16x128xf32> to vector<1x16x128xbf16>
    %c0_32 = arith.constant 0 : index
    %c1_33 = arith.constant 1 : index
    %c0_34 = arith.constant 0 : index
    %39 = vector.load %arg7[%c0_32, %c1_33, %c0_34] : memref<1x18x128xbf16, #tpu.memory_space<vmem>>, vector<1x16x128xbf16>
    tpu.vector_store %arg7[%c0_32, %c1_33, %c0_34], %38 {strides = array<i32>} : memref<1x18x128xbf16, #tpu.memory_space<vmem>>, vector<1x16x128xbf16>,
    %cst_35 = arith.constant 0.000000e+00 : f32
    %40 = vector.broadcast %cst_35 : f32 to vector<16x128xf32>
    %c0_36 = arith.constant 0 : index
    %c0_37 = arith.constant 0 : index
    %c0_38 = arith.constant 0 : index
    %41 = vector.load %arg7[%c0_36, %c0_37, %c0_38] : memref<1x18x128xbf16, #tpu.memory_space<vmem>>, vector<1x16x128xbf16>
    %42 = vector.shape_cast %41 : vector<1x16x128xbf16> to vector<16x128xbf16>
    %c0_39 = arith.constant 0 : index
    %c0_40 = arith.constant 0 : index
    %c0_41 = arith.constant 0 : index
    %43 = vector.load %arg4[%c0_39, %c0_40, %c0_41] : memref<3x128x128xbf16, #tpu.memory_space<vmem>>, vector<1x128x128xbf16>
    %44 = vector.shape_cast %43 : vector<1x128x128xbf16> to vector<128x128xbf16>
    %cst_42 = arith.constant dense<0.000000e+00> : vector<16x128xf32>
    %45 = tpu.matmul %42, %44, %cst_42 {dimension_numbers = #tpu.dot_dimension_numbers<[1], [0], [0], [1], [0, 0, 1, 1], [], []>} : vector<16x128xbf16>, vector<128x128xbf16>, vector<16x128xf32> -> vector<16x128xf32>
    %46 = arith.addf %40, %45 : vector<16x128xf32>
    %c0_43 = arith.constant 0 : index
    %c1_44 = arith.constant 1 : index
    %c0_45 = arith.constant 0 : index
    %47 = vector.load %arg7[%c0_43, %c1_44, %c0_45] : memref<1x18x128xbf16, #tpu.memory_space<vmem>>, vector<1x16x128xbf16>
    %48 = vector.shape_cast %47 : vector<1x16x128xbf16> to vector<16x128xbf16>
    %c1_46 = arith.constant 1 : index
    %c0_47 = arith.constant 0 : index
    %c0_48 = arith.constant 0 : index
    %49 = vector.load %arg4[%c1_46, %c0_47, %c0_48] : memref<3x128x128xbf16, #tpu.memory_space<vmem>>, vector<1x128x128xbf16>
    %50 = vector.shape_cast %49 : vector<1x128x128xbf16> to vector<128x128xbf16>
    %cst_49 = arith.constant dense<0.000000e+00> : vector<16x128xf32>
    %51 = tpu.matmul %48, %50, %cst_49 {dimension_numbers = #tpu.dot_dimension_numbers<[1], [0], [0], [1], [0, 0, 1, 1], [], []>} : vector<16x128xbf16>, vector<128x128xbf16>, vector<16x128xf32> -> vector<16x128xf32>
    %52 = arith.addf %46, %51 : vector<16x128xf32>
    %c0_50 = arith.constant 0 : index
    %c2_51 = arith.constant 2 : index
    %c0_52 = arith.constant 0 : index
    %53 = vector.load %arg7[%c0_50, %c2_51, %c0_52] : memref<1x18x128xbf16, #tpu.memory_space<vmem>>, vector<1x16x128xbf16>
    %54 = vector.shape_cast %53 : vector<1x16x128xbf16> to vector<16x128xbf16>
    %c2_53 = arith.constant 2 : index
    %c0_54 = arith.constant 0 : index
    %c0_55 = arith.constant 0 : index
    %55 = vector.load %arg4[%c2_53, %c0_54, %c0_55] : memref<3x128x128xbf16, #tpu.memory_space<vmem>>, vector<1x128x128xbf16>
    %56 = vector.shape_cast %55 : vector<1x128x128xbf16> to vector<128x128xbf16>
    %cst_56 = arith.constant dense<0.000000e+00> : vector<16x128xf32>
    %57 = tpu.matmul %54, %56, %cst_56 {dimension_numbers = #tpu.dot_dimension_numbers<[1], [0], [0], [1], [0, 0, 1, 1], [], []>} : vector<16x128xbf16>, vector<128x128xbf16>, vector<16x128xf32> -> vector<16x128xf32>
    %58 = arith.addf %52, %57 : vector<16x128xf32>
    %59 = vector.broadcast %2 : vector<1x128xf32> to vector<16x128xf32>
    %60 = arith.mulf %58, %59 : vector<16x128xf32>
    %61 = vector.broadcast %3 : vector<1x128xf32> to vector<16x128xf32>
    %62 = arith.addf %60, %61 : vector<16x128xf32>
    %63 = arith.addf %62, %27 : vector<16x128xf32>
    %cst_57 = arith.constant 0.000000e+00 : f32
    %64 = vector.broadcast %cst_57 : f32 to vector<16x128xf32>
    %65 = arith.maximumf %63, %64 : vector<16x128xf32>
    %66 = vector.shape_cast %65 : vector<16x128xf32> to vector<1x16x128xf32>
    %c0_58 = arith.constant 0 : index
    %c0_59 = arith.constant 0 : index
    %c0_60 = arith.constant 0 : index
    %67 = vector.load %arg6[%c0_58, %c0_59, %c0_60] : memref<1x16x128xf32, #tpu.memory_space<vmem>>, vector<1x16x128xf32>
    tpu.vector_store %arg6[%c0_58, %c0_59, %c0_60], %66 {strides = array<i32>} : memref<1x16x128xf32, #tpu.memory_space<vmem>>, vector<1x16x128xf32>,
    return
  }
  func.func @transform_0(%arg0: i32) -> (i32, i32, i32) {
    %c0_i32 = arith.constant 0 : i32
    %c0_i32_0 = arith.constant 0 : i32
    %c0_i32_1 = arith.constant 0 : i32
    return %arg0, %c0_i32, %c0_i32_0 : i32, i32, i32
  }
  func.func @transform_1(%arg0: i32) -> (i32, i32, i32) {
    %c0_i32 = arith.constant 0 : i32
    %c0_i32_0 = arith.constant 0 : i32
    %c0_i32_1 = arith.constant 0 : i32
    %c0_i32_2 = arith.constant 0 : i32
    return %c0_i32, %c0_i32_0, %c0_i32_1 : i32, i32, i32
  }
  func.func @transform_2(%arg0: i32) -> (i32, i32) {
    %c0_i32 = arith.constant 0 : i32
    %c0_i32_0 = arith.constant 0 : i32
    %c0_i32_1 = arith.constant 0 : i32
    return %c0_i32, %c0_i32_0 : i32, i32
  }
  func.func @transform_3(%arg0: i32) -> (i32, i32, i32) {
    %c0_i32 = arith.constant 0 : i32
    %c0_i32_0 = arith.constant 0 : i32
    %c0_i32_1 = arith.constant 0 : i32
    %c0_i32_2 = arith.constant 0 : i32
    return %c0_i32, %c0_i32_0, %c0_i32_1 : i32, i32, i32
  }
  func.func @transform_4(%arg0: i32) -> (i32, i32) {
    %c0_i32 = arith.constant 0 : i32
    %c0_i32_0 = arith.constant 0 : i32
    %c0_i32_1 = arith.constant 0 : i32
    return %c0_i32, %c0_i32_0 : i32, i32
  }
  func.func @transform_5(%arg0: i32) -> (i32, i32, i32) {
    %c0_i32 = arith.constant 0 : i32
    %c0_i32_0 = arith.constant 0 : i32
    %c0_i32_1 = arith.constant 0 : i32
    return %arg0, %c0_i32, %c0_i32_0 : i32, i32, i32
  }
}

</mosaic_0001>

<bundles_post_ra>
// kernel: tpu_custom_call.1
= control target key start
LH: loop header
LB: loop body
LE: loop exit
PB: predicated region body
PF: predicated region fallthrough
CT: control target
= control target key end

     0   :  { %10 = vsyncpa [#allocation4], 0  ;;  %s2039_s0 = inlined_call_operand.vmem [shape: bf16[2,18,128], index: 0, kind: input, shape index: {}]   ;;  %s2040_s1 = inlined_call_operand.hbm [shape: bf16[2,128,128], index: 1, kind: input, shape index: {}]   ;;  %s2041_s2 = inlined_call_operand.hbm [shape: bf16[128,256], index: 2, kind: input, shape index: {}]   ;;  %s2042_s3 = inlined_call_operand.hbm [shape: bf16[3,128,128], index: 3, kind: input, shape index: {}]   ;;  %s2043_s4 = inlined_call_operand.vmem [shape: f32[6,128], index: 4, kind: input, shape index: {}]   ;;  %s2044_s5 = inlined_call_operand.hbm [shape: f32[2,16,128], index: 5, kind: output, shape index: {}]  }
   0x1   :  { %11 = vsyncpa [#allocation7], 0 }
   0x2   :  { %12 = vsyncpa [#allocation5], 0 }
   0x3   :  { %14 = vsyncpa [#allocation5 + $0x1], 0  ;;  %s1794_s18 = smov 0   ;;  %s1796_s19 = smov 0  }
   0x4   :  { %s1798_s20 = smov 0   ;;  %s1800_s21 = smov 0  }
   0x5 LB: > { %s1815_s22 = sadd.s32 4294967295, %s1749_s21   ;;  %s1216_s23 = sadd.s32 4294967294, %s1749_s21   ;;  %s1749_s21 = sphi %s1800_s21, %s2060_s21   ;;  %s1745_s20 = sphi %s1798_s20, %s2059_s20   ;;  %s1741_s19 = sphi %s1796_s19, %s2058_s19   ;;  %s1737_s18 = sphi %s1794_s18, %s2057_s18  }
   0x6   : > { %s1819_s24 = sadd.s32 1, %s1749_s21   ;;  %s137_s25 = sadd.s32 1, %s1745_s20 }
   0x7   : > { %s134_s26 = ssub.s32 %s1749_s21, %s1819_s24  ;;  %p147_p0 = scmp.ne.s32.totalorder %s1745_s20, %s1741_s19 }
   0x8   : > { %p135_p1 = scmp.eq.s32.totalorder %s134_s26, 0  ;;  %p148_p2 = scmp.eq.s32.totalorder %s1815_s22, 1 }
   0x9   : > { %p153_p3 = scmp.ne.s32.totalorder %s1741_s19, %s1737_s18  ;;  %p154_p4 = scmp.eq.s32.totalorder %s1216_s23, 1 }
   0xa   : > { %s1830_s27 = scalar_select %p135_p1, %s1745_s20, %s137_s25  }
   0xb   : > { %p1832_p5 = por %p148_p2, %p147_p0  ;;  %p1836_p6 = por %p154_p4, %p153_p3 }
   0xc   : > { %p1217_p7 = scmp.ge.s32.totalorder %s1749_s21, 1  ;;  %p161_p8 = scmp.lt.s32.totalorder %s1749_s21, 3 }
   0xd   : > { %s2047_s29 = scalar_select %p1836_p6, 1, 0 }
   0xe   : > { %p2045_p9 = scmp.eq.s32.totalorder %s1815_s22, 0  ;;  %p1843_p10 = pnand %p1217_p7, %p161_p8 }
   0xf   : > { %s1751_s6 = smov [#allocation6]   ;;  %s1752_s9 = smov [#allocation3]  }
  0x10   : > { %s186_s7 = sshll.u32 %s1751_s6, 4  ;;  %p1467_p11 = pneg %p1843_p10  ;;  %s187_s7 = int_to_ptr.vmem [resolvable:$true] %s186_s7 }
  0x11   : > { %s173_s10 = sshll.u32 %s1752_s9, 4  ;;  %s1614_s11 = scalar_lea.vmem %s187_s7, 2048  ;;  %s174_s10 = int_to_ptr.vmem [resolvable:$true] %s173_s10 }
  0x12   : > { %p1851_p12 = pnand %p2045_p9, %p1467_p11  ;;  %p1615_p0 = scmp.ne.s32.totalorder %s187_s7, %s1614_s11 }
  0x13   : > { %p1622_p3 = scmp.lt.s32.totalorder %s187_s7, %s187_s7  ;;  %p1623_p4 = scmp.lt.s32.totalorder %s1614_s11, %s1614_s11 }
  0x14   : > { %p1605_p13 = pneg %p1851_p12 }
  0x15   : > { %p1624_p7 = por %p1623_p4, %p1622_p3 }
  0x16   : > { %p1617_p1 = pnand %p1615_p0, %p1605_p13 }
  0x18   : > { %p1618_p2 = pneg %p1617_p1 }
  0x1a   : > { %p1625_p8 = pnand %p1624_p7, %p1618_p2 }
  0x1c   : > { %1628 = shalt.err (!%p1625_p8)
}
  0x1d   : > { %s1753_s12 = smov 128   ;;  %s1754_s13 = smov 8  }
  0x1e   : > { %1473 = dma.hbm_to_vmem [thread:$0]  (!%p1851_p12), %s2041_s2, 2048, %s187_s7, [#allocation7], %s1753_s12, %s1753_s12, %s1754_s13  }
  0x1f   : > { %s1640_s16 = scalar_lea.vmem %s174_s10, 2048  ;;  %p1648_p9 = scmp.lt.s32.totalorder %s174_s10, %s174_s10 }
  0x20   : > { %p1641_p11 = scmp.ne.s32.totalorder %s174_s10, %s1640_s16  ;;  %p1649_p6 = scmp.lt.s32.totalorder %s1640_s16, %s1640_s16 }
  0x22   : > { %p1643_p0 = pnand %p1641_p11, %p1605_p13  ;;  %p1650_p3 = por %p1649_p6, %p1648_p9 }
  0x24   : > { %p1644_p1 = pneg %p1643_p0 }
  0x26   : > { %p1651_p2 = pnand %p1650_p3, %p1644_p1 }
  0x28   : > { %1654 = shalt.err (!%p1651_p2)
}
  0x29   : > { %s1755_s17 = smov 64   ;;  %s1756_s23 = smov 4  }
  0x2a   : > { %1470 = dma.hbm_to_vmem [thread:$0]  (!%p1851_p12), %s2040_s1, 2048, %s174_s10, [#allocation4], %s1755_s17, %s1755_s17, %s1756_s23  }
  0x2b   : > { %s1757_s6 = smov [#allocation8]  }
  0x2c   : > { %s199_s7 = sshll.u32 %s1757_s6, 4  ;;  %s200_s7 = int_to_ptr.vmem [resolvable:$true] %s199_s7 }
  0x2d   : > { %s1666_s9 = scalar_lea.vmem %s200_s7, 3072  ;;  %p1674_p9 = scmp.lt.s32.totalorder %s200_s7, %s200_s7 }
  0x2e   : > { %p1667_p4 = scmp.ne.s32.totalorder %s200_s7, %s1666_s9  ;;  %p1675_p8 = scmp.lt.s32.totalorder %s1666_s9, %s1666_s9 }
  0x30   : > { %p1669_p7 = pnand %p1667_p4, %p1605_p13  ;;  %p1676_p11 = por %p1675_p8, %p1674_p9 }
  0x32   : > { %p1670_p6 = pneg %p1669_p7 }
  0x34   : > { %p1677_p0 = pnand %p1676_p11, %p1670_p6 }
  0x36   : > { %1680 = shalt.err (!%p1677_p0)
}
  0x37   : > { %1476 = dma.hbm_to_vmem [thread:$0]  (!%p1851_p12), %s2042_s3, 3072, %s200_s7, [#allocation7], %s1755_s17, %s1755_s17, %s1756_s23  }
  0x38   : > { %226 = sbr.rel (%p1843_p10) target bundleno = 615 (0x267), region = 40  ;;  %p2050_p1 = scmp.eq.s32.totalorder (!%p1843_p10), %s1815_s22, 0 }
  0x3d   : > { %1724 = dma.done.wait (%p2050_p1), [#allocation4], 2048   ;;  %p2051_p13 = pmov %p2050_p1 }
  0x3e   : > { %p2052_p3 = pmov %p2050_p1 }
  0x3f   : > { %1726 = vsyncadd (%p2051_p13), [#allocation4], 4294965248 }
  0x40   : > { %1728 = dma.done.wait (%p2052_p3), [#allocation7], 5120   ;;  %p2053_p2 = pmov %p2050_p1 }
  0x41   : > { %v1758_v0 = vmov 0.0   ;;  %vm1759_vm0 = vmmov 0   ;;  %v1532_v1 = vld [vmem:[#allocation3 + $0x78] sm:$0xff]   ;;  %v1534_v3 = vld [vmem:[#allocation3 + $0x70] sm:$0xff]   ;;  %p262_p10 = scmp.lt.s32.totalorder %s1815_s22, 1  ;;  %v1536_v5 = vld [vmem:[#allocation3 + $0x68] sm:$0xff]  }
  0x42   : > { %1730 = vsyncadd (%p2053_p2), [#allocation7], 4294962176  ;;  %1352 = vmatprep.subr.bf16.mxu0 %v1758_v0  ;;  %1372 = vmatprep.subr.bf16.mxu1 %v1758_v0  ;;  %v1533_v2 = vld [vmem:[#allocation3 + $0x38] sm:$0xff]   ;;  %v1535_v4 = vld [vmem:[#allocation3 + $0x30] sm:$0xff]   ;;  %vm317_vm1 = vcmask 1046528   ;;  %v1760_v31 = vmov 0  }
  0x43   : > { %1368 = vmatprep.mubr.msk.bf16.mxu0 %vm1759_vm0, %v1758_v0  ;;  %1388 = vmatprep.mubr.msk.bf16.mxu1 %vm1759_vm0, %v1758_v0  ;;  %v1537_v6 = vld [vmem:[#allocation3 + $0x28] sm:$0xff]   ;;  %s263_s30 = scalar_select %p262_p10, %s1815_s22, 1  ;;  %v1538_v7 = vld [vmem:[#allocation3 + $0x60] sm:$0xff]   ;;  %v1540_v9 = vld [vmem:[#allocation3 + $0x58] sm:$0xff]   ;;  %vm524_vm2 = vsmask.f32 7424 }
  0x44   : > { %1353 = vmatpush3.bf16.msra.mxu0 %v1532_v1  ;;  %1373 = vmatpush3.bf16.msra.mxu1 %v1533_v2  ;;  %v1539_v8 = vld [vmem:[#allocation3 + $0x20] sm:$0xff]   ;;  %v1541_v10 = vld [vmem:[#allocation3 + $0x18] sm:$0xff]   ;;  %v1542_v11 = vld [vmem:[#allocation3 + $0x50] sm:$0xff]   ;;  %vm691_vm3 = vcmask 1040384   ;;  %vm692_vm4 = vsmask.f32 256 }
  0x45   : > { %1354 = vmatprep.subr.bf16.mxu0 %v1758_v0  ;;  %1374 = vmatprep.subr.bf16.mxu1 %v1758_v0  ;;  %s1452_s8 = smul.u32 12, %s263_s30  ;;  %v1543_v12 = vld [vmem:[#allocation3 + $0x10] sm:$0xff]   ;;  %v1544_v15 = vld [vmem:[#allocation3 + $0x48] sm:$0xff]   ;;  %v1546_v19 = vld [vmem:[#allocation3 + $0x40] sm:$0xff]   ;;  %vm697_vm6 = vsmask.f32 7938 }
  0x46   : > { %v1545_v18 = vld [vmem:[#allocation3 + $0x8] sm:$0xff]   ;;  %v1547_v20 = vld [vmem:[#allocation3] sm:$0xff]   ;;  %v1554_v24 = vld [vmem:[#allocation6 + $0x74] ss:$8 sps:$4 sm:$0xff]   ;;  %vm730_vm8 = vcmask 1043456   ;;  %s259_s12 = sand.u32 1, %s1741_s19  }
  0x47   : > { %s1909_s14 = scalar_lea.vmem %s2039_s0, %s1452_s8  ;;  %v1552_v25 = vld [vmem:[#allocation6 + $0x70] ss:$8 sps:$4 sm:$0xff]   ;;  %v1557_v26 = vld [vmem:[#allocation6 + $0x64] ss:$8 sps:$4 sm:$0xff]   ;;  %v1555_v29 = vld [vmem:[#allocation6 + $0x60] ss:$8 sps:$4 sm:$0xff]  }
  0x48   : > { %1355 = vmatpush3.bf16.msra.mxu0 %v1534_v3  ;;  %1375 = vmatpush3.bf16.msra.mxu1 %v1535_v4  ;;  %v273_v13 = vld [vmem:[%s1909_s14 + $0x4] sm:$0xf]  ;;  %v290_v14 = vld [vmem:[%s1909_s14] sm:$0xe]  ;;  %v1563_v33 = vld [vmem:[#allocation6 + $0x44] ss:$8 sps:$4 sm:$0xff]  }
  0x49   : > { %1356 = vmatprep.subr.bf16.mxu0 %v1758_v0  ;;  %1376 = vmatprep.subr.bf16.mxu1 %v1758_v0  ;;  %v1228_v16 = vcombine.low %v290_v14, %v273_v13  ;;  %v1549_v17 = vld [vmem:[%s1909_s14 + $0x8] ss:$0 sps:$4 sm:$0x11]   ;;  %v272_v23 = vld [vmem:[%s1909_s14] sm:$0xf]  ;;  %vm1934_vm5 = vmand %vm691_vm3, %vm692_vm4  ;;  %s1226_s10 = sshll.u32 %s259_s12, 4 }
  0x4a   : > { %v319_v22 = vrot.slane %v1549_v17, 1  ;;  %v1238_v28 = vcombine.low %v272_v23, %v273_v13  ;;  %v1560_v30 = vld [vmem:[#allocation6 + $0x54] ss:$8 sps:$4 sm:$0xff]   ;;  %v1558_v32 = vld [vmem:[#allocation6 + $0x50] ss:$8 sps:$4 sm:$0xff]   ;;  %v533_v46 = vshll.u32 %v1549_v17, 16  ;;  %vm698_vm7 = vmand %vm691_vm3, %vm697_vm6 }
  0x4b   : > { %v318_v21 = vrot.slane %v1228_v16, 1  ;;  %v1561_v34 = vld [vmem:[#allocation6 + $0x40] ss:$8 sps:$4 sm:$0xff]   ;;  %v504_v35 = vld [vmem:[%s1909_s14] sm:$0xf]  ;;  %v1576_v52 = vld [vmem:[#allocation8 + $0x38] sm:$0xff]  }
  0x4c   : > { %1357 = vmatpush3.bf16.msra.mxu0 %v1536_v5  ;;  %1377 = vmatpush3.bf16.msra.mxu1 %v1537_v6  ;;  %v1566_v36 = vld [vmem:[#allocation6 + $0x34] ss:$8 sps:$4 sm:$0xff]   ;;  %v1247_v37 = vcombine.low %v504_v35, %v273_v13  ;;  %v1564_v38 = vld [vmem:[#allocation6 + $0x30] ss:$8 sps:$4 sm:$0xff]   ;;  %v1569_v39 = vld [vmem:[#allocation6 + $0x24] ss:$8 sps:$4 sm:$0xff]  }
  0x4d   : > { %1358 = vmatprep.subr.bf16.mxu0 %v1758_v0  ;;  %1378 = vmatprep.subr.bf16.mxu1 %v1758_v0  ;;  %v320_v27 = vsel %vm317_vm1, %v318_v21, %v319_v22  ;;  %v1567_v40 = vld [vmem:[#allocation6 + $0x20] ss:$8 sps:$4 sm:$0xff]   ;;  %v1572_v42 = vld [vmem:[#allocation6 + $0x14] ss:$8 sps:$4 sm:$0xff]   ;;  %v1570_v43 = vld [vmem:[#allocation6 + $0x10] ss:$8 sps:$4 sm:$0xff]  }
  0x4e   : > { %v528_v41 = vshll.u32 %v1247_v37, 16  ;;  %v526_v44 = vshrl.u32 %v1247_v37, 16  ;;  %v1575_v47 = vld [vmem:[#allocation6 + $0x4] ss:$8 sps:$4 sm:$0xff]   ;;  %v1573_v48 = vld [vmem:[#allocation6] ss:$8 sps:$4 sm:$0xff]   ;;  %vm731_vm9 = vmand %vm730_vm8, %vm697_vm6 }
  0x4f   : > { %v535_v50 = vrot.slane %v533_v46, 1  ;;  %v1577_v53 = vld [vmem:[#allocation8 + $0x30] sm:$0xff]   ;;  %v1578_v54 = vld [vmem:[#allocation8 + $0x78] sm:$0xff]   ;;  %v1579_v58 = vld [vmem:[#allocation8 + $0x28] sm:$0xff]   ;;  %vm708_vm10 = vsmask.f32 4368 }
  0x50   : > { %1359 = vmatpush3.bf16.msra.mxu0 %v1538_v7  ;;  %1379 = vmatpush3.bf16.msra.mxu1 %v1539_v8  ;;  %v530_v45 = vrot.slane %v528_v41, 1  ;;  %v694_v55 = vld [vmem:[#allocation2] sm:$0x1]  ;;  %v699_v57 = vld [vmem:[#allocation2 + $0x8] sm:$0x1]  ;;  %v1581_v62 = vld [vmem:[#allocation8 + $0x20] sm:$0xff]  }
  0x51   : > { %1360 = vmatprep.subr.bf16.mxu0 %v1758_v0  ;;  %1380 = vmatprep.subr.bf16.mxu1 %v1758_v0  ;;  %v695_v59 = vsel %vm1934_vm5, 0, %v694_v55  ;;  %v700_v60 = vsel %vm698_vm7, 0, %v699_v57  ;;  %v1580_v61 = vld [vmem:[#allocation8 + $0x70] sm:$0xff]   ;;  %v1582_v63 = vld [vmem:[#allocation8 + $0x68] sm:$0xff]   ;;  %v1583_v1 = vld [vmem:[#allocation8 + $0x18] sm:$0xff]   ;;  %s1306_s13 = sshll.u32 %s1815_s22, 8 }
  0x52   : > { %v531_v49 = vor.u32 %v530_v45, %v526_v44  ;;  %696 = vst [vmem:[#allocation2] sm:$0x1] %v695_v59  ;;  %701 = vst [vmem:[#allocation2 + $0x8] sm:$0x1] %v700_v60  ;;  %v1584_v2 = vld [vmem:[#allocation8 + $0x60] sm:$0xff]   ;;  %v1585_v3 = vld [vmem:[#allocation8 + $0x10] sm:$0xff]   ;;  %s1995_s23 = scalar_lea.hbm %s2044_s5, %s1306_s13 }
  0x53   : > { %v1586_v4 = vld [vmem:[#allocation8 + $0x58] sm:$0xff]   ;;  %v1587_v5 = vld [vmem:[#allocation8 + $0x8] sm:$0xff]   ;;  %v1588_v6 = vld [vmem:[#allocation8 + $0x50] sm:$0xff]   ;;  %s261_s14 = scalar_lea.vmem [#allocation9], %s1226_s10  ;;  %s1999_s25 = scalar_lea.sflag [#allocation5], %s259_s12 }
  0x54   : > { %1361 = vmatpush3.bf16.msra.mxu0 %v1540_v9  ;;  %1381 = vmatpush3.bf16.msra.mxu1 %v1541_v10  ;;  %v536_v51 = vsel %vm524_vm2, %v531_v49, %v535_v50  ;;  %v1589_v7 = vld [vmem:[#allocation8] sm:$0xff]   ;;  %v1590_v8 = vld [vmem:[#allocation8 + $0x48] sm:$0xff]   ;;  %v1267_v22 = vld [vmem:[%s2043_s4 + $0x1] ss:$0 sm:$0xff]  ;;  %s1123_s15 = sshll.u32 %s261_s14, 4  ;;  %s1761_s22 = smov [#allocation9]   ;;  %s1997_s15 = int_to_ptr.vmem [resolvable:$true] %s1123_s15 }
  0x55   : > { %1362 = vmatprep.subr.bf16.mxu0 %v1758_v0  ;;  %1382 = vmatprep.subr.bf16.mxu1 %v1758_v0  ;;  %v1592_v9 = vld [vmem:[#allocation8 + $0x40] sm:$0xff]   ;;  %vm709_vm11 = vmor %vm692_vm4, %vm708_vm10  ;;  %v1595_v56 = vld [vmem:[#allocation8 + $0xb0] sm:$0xff]   ;;  %s1681_s26 = scalar_lea.vmem %s1997_s15, 256  ;;  %s1685_s6 = sshll.u32 %s1761_s22, 4  ;;  %s1686_s6 = int_to_ptr.vmem [resolvable:$false] %s1685_s6 }
  0x56   : > { %p1682_p12 = scmp.ne.s32.totalorder %s1997_s15, %s1681_s26  ;;  %s1687_s7 = scalar_lea.vmem %s1686_s6, 512 }
  0x57   : > { %p1688_p6 = scmp.lt.s32.totalorder %s1997_s15, %s1686_s6  ;;  %p1689_p9 = scmp.lt.s32.totalorder %s1687_s7, %s1681_s26 }
  0x58   : > { %1363 = vmatpush3.bf16.msra.mxu0 %v1542_v11  ;;  %1383 = vmatpush3.bf16.msra.mxu1 %v1543_v12  ;;  %p1683_p4 = pnand %p1682_p12, %p1832_p5 }
  0x59   : > { %1364 = vmatprep.subr.bf16.mxu0 %v1758_v0  ;;  %1384 = vmatprep.subr.bf16.mxu1 %v1758_v0  ;;  %v736_v44 = vld [vmem:[#allocation2 + $0x8] sm:$0x1]  ;;  %p1690_p8 = por %p1689_p9, %p1688_p6 }
  0x5a   : > { %p1684_p7 = pneg %p1683_p4 }
  0x5c   : > { %1365 = vmatpush3.bf16.msra.mxu0 %v1544_v15  ;;  %1385 = vmatpush3.bf16.msra.mxu1 %v1545_v18  ;;  %p1691_p11 = pnand %p1690_p8, %p1684_p7 }
  0x5d   : > { %1366 = vmatprep.subr.bf16.mxu0 %v1758_v0  ;;  %1386 = vmatprep.subr.bf16.mxu1 %v1758_v0 }
  0x60   : > { %1367 = vmatpush3.bf16.msra.mxu0 %v1546_v19  ;;  %1387 = vmatpush3.bf16.msra.mxu1 %v1547_v20  ;;  %v1266_v19 = vld [vmem:[%s2043_s4] ss:$0 sm:$0xff] }
  0x61   : > { %618 = vmatprep.subr.bf16.mxu0 %v1554_v24  ;;  %1392 = vmatprep.subr.bf16.mxu1 %v1758_v0 }
  0x63   : > { %1369 = vmatmul.mubr.bf16.vlgmr.msra.gmra.mxu0 %v320_v27  ;;  %1389 = vmatmul.mubr.bf16.vlgmr.msra.gmra.mxu1 %v1238_v28 }
  0x64   : > { %619 = vmatpush1.bf16.msra.mxu0 %v1552_v25  ;;  %650 = vmatprep.mubr.bf16.mxu0 %v1760_v31 }
  0x65   : > { %620 = vmatprep.subr.bf16.mxu0 %v1557_v26  ;;  %1408 = vmatprep.mubr.msk.bf16.mxu1 %vm1759_vm0, %v1758_v0 }
  0x66   : > { %1393 = vmatpush3.bf16.msra.mxu1 %v1578_v54 }
  0x67   : > { %1394 = vmatprep.subr.bf16.mxu1 %v1758_v0 }
  0x68   : > { %621 = vmatpush1.bf16.msra.mxu0 %v1555_v29 }
  0x69   : > { %622 = vmatprep.subr.bf16.mxu0 %v1560_v30 }
  0x6a   : > { %1395 = vmatpush3.bf16.msra.mxu1 %v1580_v61  ;;  %v1594_v61 = vld [vmem:[#allocation8 + $0xb8] sm:$0xff]  }
  0x6b   : > { %1396 = vmatprep.subr.bf16.mxu1 %v1758_v0 }
  0x6c   : > { %623 = vmatpush1.bf16.msra.mxu0 %v1558_v32 }
  0x6d   : > { %624 = vmatprep.subr.bf16.mxu0 %v1563_v33 }
  0x6e   : > { %1397 = vmatpush3.bf16.msra.mxu1 %v1582_v63  ;;  %v1596_v63 = vld [vmem:[#allocation8 + $0xa8] sm:$0xff]  }
  0x6f   : > { %1398 = vmatprep.subr.bf16.mxu1 %v1758_v0 }
  0x70   : > { %625 = vmatpush1.bf16.msra.mxu0 %v1561_v34 }
  0x71   : > { %626 = vmatprep.subr.bf16.mxu0 %v1566_v36 }
  0x72   : > { %1399 = vmatpush3.bf16.msra.mxu1 %v1584_v2  ;;  %v1598_v2 = vld [vmem:[#allocation8 + $0x98] sm:$0xff]  }
  0x73   : > { %1400 = vmatprep.subr.bf16.mxu1 %v1758_v0 }
  0x74   : > { %627 = vmatpush1.bf16.msra.mxu0 %v1564_v38  ;;  %v732_v38 = vld [vmem:[#allocation2] sm:$0xf] }
  0x75   : > { %628 = vmatprep.subr.bf16.mxu0 %v1569_v39 }
  0x76   : > { %1401 = vmatpush3.bf16.msra.mxu1 %v1586_v4  ;;  %v1600_v4 = vld [vmem:[#allocation8 + $0x88] sm:$0xff]  }
  0x77   : > { %1402 = vmatprep.subr.bf16.mxu1 %v1758_v0 }
  0x78   : > { %629 = vmatpush1.bf16.msra.mxu0 %v1567_v40 }
  0x79   : > { %630 = vmatprep.subr.bf16.mxu0 %v1572_v42 }
  0x7a   : > { %1403 = vmatpush3.bf16.msra.mxu1 %v1588_v6 }
  0x7b   : > { %1404 = vmatprep.subr.bf16.mxu1 %v1758_v0 }
  0x7c   : > { %631 = vmatpush1.bf16.msra.mxu0 %v1570_v43 }
  0x7d   : > { %632 = vmatprep.subr.bf16.mxu0 %v1575_v47 }
  0x7e   : > { %1405 = vmatpush3.bf16.msra.mxu1 %v1590_v8 }
  0x7f   : > { %1406 = vmatprep.subr.bf16.mxu1 %v1758_v0 }
  0x80   : > { %633 = vmatpush1.bf16.msra.mxu0 %v1573_v48 }
  0x81   : > { %1412 = vmatprep.subr.bf16.mxu0 %v1758_v0 }
  0x82   : > { %1407 = vmatpush3.bf16.msra.mxu1 %v1592_v9 }
  0x83   : > { %651 = vmatmul.mubr.bf16.vlgmr.msra.gmra.mxu0 %v536_v51  ;;  %1432 = vmatprep.subr.bf16.mxu1 %v1758_v0 }
  0x84   : > { %1428 = vmatprep.mubr.msk.bf16.mxu0 %vm1759_vm0, %v1758_v0  ;;  %1413 = vmatpush3.bf16.msra.mxu0 %v1576_v52 }
  0x85   : > { %1414 = vmatprep.subr.bf16.mxu0 %v1758_v0 }
  0x88   : > { %1415 = vmatpush3.bf16.msra.mxu0 %v1577_v53 }
  0x89   : > { %1416 = vmatprep.subr.bf16.mxu0 %v1758_v0 }
  0x8c   : > { %1417 = vmatpush3.bf16.msra.mxu0 %v1579_v58 }
  0x8d   : > { %1418 = vmatprep.subr.bf16.mxu0 %v1758_v0 }
  0x90   : > { %1419 = vmatpush3.bf16.msra.mxu0 %v1581_v62 }
  0x91   : > { %1420 = vmatprep.subr.bf16.mxu0 %v1758_v0 }
  0x94   : > { %1421 = vmatpush3.bf16.msra.mxu0 %v1583_v1  ;;  %v1597_v1 = vld [vmem:[#allocation8 + $0xa0] sm:$0xff]  }
  0x95   : > { %1422 = vmatprep.subr.bf16.mxu0 %v1758_v0 }
  0x98   : > { %1423 = vmatpush3.bf16.msra.mxu0 %v1585_v3  ;;  %v1599_v3 = vld [vmem:[#allocation8 + $0x90] sm:$0xff]  }
  0x99   : > { %1424 = vmatprep.subr.bf16.mxu0 %v1758_v0 }
  0x9c   : > { %1425 = vmatpush3.bf16.msra.mxu0 %v1587_v5 }
  0x9d   : > { %1426 = vmatprep.subr.bf16.mxu0 %v1758_v0 }
  0xa0   : > { %1427 = vmatpush3.bf16.msra.mxu0 %v1589_v7  ;;  %v1601_v7 = vld [vmem:[#allocation8 + $0x80] sm:$0xff]  }
 0x123   : > { %v404_v10 = vpop.f32.mrf.mxu0  ;;  %v497_v11 = vpop.f32.mrf.mxu1 }
 0x124   : > { %v498_v18 = vadd.f32 %v497_v11, %v404_v10 }
 0x125   : > { %v1370_v12 = vpop.f32.mrf.mxu0  ;;  %v1390_v13 = vpop.f32.mrf.mxu1 }
 0x127   : > { %v407_v14 = vpop.f32.mrf.mxu0  ;;  %v500_v15 = vpop.f32.mrf.mxu1 }
 0x128   : > { %v501_v24 = vadd.f32 %v500_v15, %v407_v14 }
 0x129   : > { %v1371_v16 = vpop.f32.mrf.mxu0  ;;  %v1391_v17 = vpop.f32.mrf.mxu1 }
 0x143   : > { %v652_v20 = vpop.f32.mrf.mxu0 }
 0x144   : > { %v661_v21 = vadd.f32 %v652_v20, %v498_v18 }
 0x145   : > { %v1960_v23 = vpop.f32.mrf.mxu0 }
 0x146   : > { %v681_v25 = vmul.f32 %v1266_v19, %v661_v21  ;;  %v1297_v21 = vld [vmem:[%s2043_s4 + $0x2] ss:$0 sm:$0xff] }
 0x147   : > { %v656_v26 = vpop.f32.mrf.mxu0 }
 0x148   : > { %v687_v27 = vadd.f32 %v1267_v22, %v681_v25  ;;  %v662_v28 = vadd.f32 %v656_v26, %v501_v24  ;;  %v1265_v26 = vld [vmem:[%s2043_s4 + $0x5] ss:$0 sm:$0xff] }
 0x149   : > { %v658_v11 = vpop.f32.mrf.mxu0 }
 0x14a   : > { %v689_v29 = vmax.f32 %v687_v27, 0.0  ;;  %v682_v30 = vmul.f32 %v1266_v19, %v662_v28  ;;  %v1298_v27 = vld [vmem:[%s2043_s4 + $0x3] ss:$0 sm:$0xff] }
 0x14c   : > { %v1304_v31 = vpack.c.bf16 %v689_v29, %v689_v29  ;;  %v688_v32 = vadd.f32 %v1267_v22, %v682_v30 }
 0x14e   : > { %v711_v33 = vshrl.u32 %v1304_v31, 16  ;;  %v690_v34 = vmax.f32 %v688_v32, 0.0  ;;  %v714_v36 = vshll.u32 %v1304_v31, 16 }
 0x150   : > { %v713_v35 = vrot.slane %v711_v33, 7  ;;  %v1305_v37 = vpack.c.bf16 %v690_v34, %v690_v34 }
 0x152   : > { %v716_v39 = vor.u32 %v714_v36, %v713_v35  ;;  %v719_v40 = vshrl.u32 %v1305_v37, 16  ;;  %v722_v43 = vshll.u32 %v1305_v37, 16  ;;  %v717_v45 = vrot.slane %v713_v35, 4 }
 0x154   : > { %v733_v41 = vsel %vm731_vm9, %v716_v39, %v732_v38  ;;  %v721_v42 = vrot.slane %v719_v40, 7 }
 0x155   : > { %734 = vst [vmem:[#allocation2] sm:$0xf] %v733_v41 }
 0x156   : > { %v724_v46 = vor.u32 %v722_v43, %v721_v42  ;;  %v726_v47 = vrot.slane %v721_v42, 4 }
 0x158   : > { %v725_v48 = vsel %vm709_vm11, %v717_v45, %v724_v46  ;;  %v737_v49 = vsel %vm1934_vm5, %v726_v47, %v736_v44 }
 0x159   : > { %735 = vst [vmem:[#allocation2 + $0x4] sm:$0xf] %v725_v48  ;;  %738 = vst [vmem:[#allocation2 + $0x8] sm:$0x1] %v737_v49 }
 0x15c   : > { %v739_v50 = vld [vmem:[#allocation2] sm:$0xf] }
 0x15d   : > { %v975_v5 = vld [vmem:[#allocation2] sm:$0xe] }
 0x160   : > { %v740_v51 = vld [vmem:[#allocation2 + $0x4] sm:$0xf]  ;;  %v1593_v53 = vld [vmem:[#allocation2 + $0x8] ss:$0 sps:$4 sm:$0x11]  }
 0x161   : > { %v1270_v52 = vcombine.low %v739_v50, %v740_v51  ;;  %v791_v55 = vshll.u32 %v1593_v53, 16  ;;  %v1288_v6 = vcombine.low %v975_v5, %v740_v51  ;;  %v997_v9 = vrot.slane %v1593_v53, 1 }
 0x163   : > { %1429 = vmatmul.mubr.bf16.vlgmr.msra.gmra.mxu0 %v1270_v52  ;;  %v786_v54 = vshll.u32 %v1270_v52, 16  ;;  %v784_v57 = vshrl.u32 %v1270_v52, 16  ;;  %v793_v60 = vrot.slane %v791_v55, 1  ;;  %v996_v8 = vrot.slane %v1288_v6, 1 }
 0x165   : > { %v788_v58 = vrot.slane %v786_v54, 1  ;;  %v998_v10 = vsel %vm317_vm1, %v996_v8, %v997_v9 }
 0x167   : > { %v789_v59 = vor.u32 %v788_v58, %v784_v57 }
 0x169   : > { %v794_v62 = vsel %vm524_vm2, %v789_v59, %v793_v60 }
 0x16a   : > { %1409 = vmatmul.mubr.bf16.vlgmr.msra.gmra.mxu1 %v794_v62 }
 0x16b   : > { %1433 = vmatpush3.bf16.msra.mxu1 %v1594_v61  ;;  %1448 = vmatprep.mubr.msk.bf16.mxu1 %vm1759_vm0, %v1758_v0 }
 0x16c   : > { %1434 = vmatprep.subr.bf16.mxu1 %v1758_v0 }
 0x16f   : > { %1435 = vmatpush3.bf16.msra.mxu1 %v1595_v56 }
 0x170   : > { %1436 = vmatprep.subr.bf16.mxu1 %v1758_v0 }
 0x173   : > { %1437 = vmatpush3.bf16.msra.mxu1 %v1596_v63 }
 0x174   : > { %1438 = vmatprep.subr.bf16.mxu1 %v1758_v0 }
 0x177   : > { %1439 = vmatpush3.bf16.msra.mxu1 %v1597_v1 }
 0x178   : > { %1440 = vmatprep.subr.bf16.mxu1 %v1758_v0 }
 0x17b   : > { %1441 = vmatpush3.bf16.msra.mxu1 %v1598_v2 }
 0x17c   : > { %1442 = vmatprep.subr.bf16.mxu1 %v1758_v0 }
 0x17f   : > { %1443 = vmatpush3.bf16.msra.mxu1 %v1599_v3 }
 0x180   : > { %1444 = vmatprep.subr.bf16.mxu1 %v1758_v0 }
 0x183   : > { %1445 = vmatpush3.bf16.msra.mxu1 %v1600_v4 }
 0x184   : > { %1446 = vmatprep.subr.bf16.mxu1 %v1758_v0  ;;  %v1264_v0 = vld [vmem:[%s2043_s4 + $0x4] ss:$0 sm:$0xff] }
 0x185   : > { %v668_v24 = vmul.f32 %v1264_v0, %v1960_v23  ;;  %v669_v33 = vmul.f32 %v1264_v0, %v658_v11 }
 0x187   : > { %1447 = vmatpush3.bf16.msra.mxu1 %v1601_v7  ;;  %v675_v32 = vadd.f32 %v1265_v26, %v668_v24  ;;  %v676_v38 = vadd.f32 %v1265_v26, %v669_v33 }
 0x18a   : > { %1449 = vmatmul.mubr.bf16.vlgmr.msra.gmra.mxu1 %v998_v10 }
 0x223   : > { %v968_v12 = vpop.f32.mrf.mxu0 }
 0x225   : > { %v1430_v13 = vpop.f32.mrf.mxu0 }
 0x227   : > { %v971_v14 = vpop.f32.mrf.mxu0 }
 0x229   : > { %v1431_v15 = vpop.f32.mrf.mxu0 }
 0x22a   : > { %v878_v16 = vpop.f32.mrf.mxu1 }
 0x22b   : > { %v969_v20 = vadd.f32 %v968_v12, %v878_v16 }
 0x22c   : > { %v1410_v17 = vpop.f32.mrf.mxu1 }
 0x22e   : > { %v881_v18 = vpop.f32.mrf.mxu1 }
 0x22f   : > { %v972_v29 = vadd.f32 %v971_v14, %v881_v18 }
 0x230   : > { %v1411_v19 = vpop.f32.mrf.mxu1 }
 0x24a   : > { %v1082_v22 = vpop.f32.mrf.mxu1 }
 0x24b   : > { %v1089_v25 = vadd.f32 %v1082_v22, %v969_v20 }
 0x24c   : > { %v1450_v28 = vpop.f32.mrf.mxu1 }
 0x24d   : > { %v1095_v30 = vmul.f32 %v1297_v21, %v1089_v25 }
 0x24e   : > { %v1085_v31 = vpop.f32.mrf.mxu1 }
 0x24f   : > { %v1101_v34 = vadd.f32 %v1298_v27, %v1095_v30  ;;  %v1090_v23 = vadd.f32 %v1085_v31, %v972_v29 }
 0x250   : > { %v1451_v35 = vpop.f32.mrf.mxu1 }
 0x251   : > { %v1103_v36 = vadd.f32 %v1101_v34, %v675_v32  ;;  %v1096_v37 = vmul.f32 %v1297_v21, %v1090_v23 }
 0x253   : > { %v1105_v39 = vmax.f32 %v1103_v36, 0.0  ;;  %v1102_v40 = vadd.f32 %v1298_v27, %v1096_v37 }
 0x255   : > { %1107 = vst [vmem:[%s261_s14] sm:$0xff] %v1105_v39  ;;  %v1104_v41 = vadd.f32 %v1102_v40, %v676_v38 }
 0x257   : > { %v1106_v42 = vmax.f32 %v1104_v41, 0.0 }
 0x259   : > { %1108 = vst [vmem:[%s261_s14 + $0x8] sm:$0xff] %v1106_v42 }
 0x25a   : > { %1694 = shalt.err (!%p1691_p11)
}
 0x25b   : > { %s1695_s9 = scalar_lea.hbm %s1995_s23, 256  ;;  %s1699_s30 = scalar_lea.hbm %s2044_s5, 512 }
 0x25c   : > { %p1696_p0 = scmp.ne.s32.totalorder %s1995_s23, %s1695_s9  ;;  %p1700_p3 = scmp.lt.s32.totalorder %s1995_s23, %s2044_s5 }
 0x25d   : > { %p1701_p2 = scmp.lt.s32.totalorder %s1699_s30, %s1695_s9 }
 0x25e   : > { %p1697_p1 = pnand %p1696_p0, %p1832_p5 }
 0x25f   : > { %p1702_p10 = por %p1701_p2, %p1700_p3 }
 0x260   : > { %p1698_p13 = pneg %p1697_p1 }
 0x262   : > { %p1703_p12 = pnand %p1702_p10, %p1698_p13 }
 0x264   : > { %1706 = shalt.err (!%p1703_p12)
}
 0x265   : > { %s1762_s13 = smov 128   ;;  %s1763_s14 = smov 8  }
 0x266   : > { %1465 = dma.vmem_to_hbm [thread:$0]  (%p1832_p5), %s1997_s15, 256, %s1995_s23, %s1999_s25, %s1762_s13, %s1762_s13, %s1763_s14  }
 0x267 PF: > { %p1487_p4 = scmp.ge.s32.totalorder %s1749_s21, 2  ;;  %s1138_s16 = sand.u32 1, %s1737_s18  }
 0x268   : > { %p2056_p7 = scmp.ne.s32.totalorder %s2047_s29, 0  ;;  %s1139_s17 = scalar_lea.sflag [#allocation5], %s1138_s16 }
 0x26a   : > { %p1478_p6 = pnand %p1487_p4, %p2056_p7 }
 0x26c   : > { %p1479_p9 = pneg %p1478_p6 }
 0x26e   : > { %1732 = dma.done.wait (%p1479_p9), %s1139_s17, 256  }
 0x26f   : > { %1734 = vsyncadd (%p1479_p9), %s1139_s17, 4294967040  ;;  %p17_p8 = scmp.ge.s32.totalorder %s1819_s24, 4   ;;  %s2057_s18 = smov %s1741_s19 }
 0x270   : > { %s2058_s19 = smov %s1745_s20  ;;  %s2059_s20 = smov %s1830_s27 }
 0x271   : > { %s2060_s21 = smov %s1819_s24  ;;  %19 = sbr.rel (!%p17_p8) target bundleno = 5 (0x5), region = 91 }
 0x276   :  { %1144 = vsyncpa [#allocation4], 1 }
 0x277   :  { %1146 = vsyncpa [#allocation4 + $0x1], 1 }
 0x278   :  { %1147 = vsyncpa [#allocation7], 1 }
 0x279   :  { %1148 = vsyncpa [#allocation5], 1 }
 0x27a   :  { %1150 = vsyncpa [#allocation5 + $0x1], 1 }

</bundles_post_ra>
